<compile_context>
chip_gen: v6e
topology: v6e:2x2x1
jax: 0.10.0
libtpu: 0.0.40
codegen_flags: <defaults>
</compile_context>

<pallas_src>
from functools import partial

import jax
import jax.numpy as jnp
from jax.experimental import pallas as pl
from jax.experimental.pallas import tpu as pltpu


def sepconv_bn_kernel(x_ref, col_ref, dw_ref, dwb_ref, pw_ref, pwb_ref, g_ref, b_ref,
                      o_ref, xf_ref, *, K, pad, H, W, eps):
    """Fused SepConv2d forward: depthwise KxK -> pointwise 1x1 -> ReLU -> BatchNorm2d.

    x_ref  : (N, Ci, H*W)  input (NCHW, spatial flattened onto lanes)
    col_ref: (1, 1, H*W)   int32 column index (m % W) for the per-tap edge masks
    dw_ref : (Ci, K*K)     depthwise weights
    dwb_ref: (Ci, 1)       depthwise bias (column)
    pw_ref : (Co, Ci)      pointwise weights
    pwb_ref: (Co, 1)       pointwise bias (column)
    g_ref  : (Co, 1)       BatchNorm gamma
    b_ref  : (Co, 1)       BatchNorm beta
    o_ref  : (N, Co, H*W)  output (lane-dense minor axis)
    xf_ref : (N, Ci, L)    VMEM scratch: H-padded plane flattened, +-pad margin (zero halo)
    """
    N, Ci, HW = x_ref.shape
    Co = pw_ref.shape[0]

    # Build the zero halo once: zero the scratch, drop the (cast-once) input into the middle.
    off = pad * (W + 1)
    xf_ref[...] = jnp.zeros(xf_ref.shape, xf_ref.dtype)
    xf_ref[:, :, off:off + HW] = x_ref[...].astype(jnp.float32)
    xf = xf_ref[...]                                    # (N, Ci, L), loaded once
    cols = col_ref[...]                                 # (1, 1, HW)

    # Depthwise conv: K*K shifted flat windows * per-channel column weights (VPU, lane-dense).
    # Vertical zero padding comes from the halo rows; horizontal padding from lane masks.
    acc = jnp.zeros((N, Ci, HW), jnp.float32)
    for kh in range(K):
        for kw in range(K):
            win = xf[:, :, kh * W + kw: kh * W + kw + HW]                  # (N, Ci, HW)
            dx = kw - pad
            if dx < 0:
                win = jnp.where(cols >= -dx, win, 0.0)
            elif dx > 0:
                win = jnp.where(cols < W - dx, win, 0.0)
            acc = acc + win * dw_ref[:, kh * K + kw: kh * K + kw + 1]      # (Ci,1) lane bcast
    h = acc + dwb_ref[...]                                                 # (N, Ci, HW)

    # Pointwise 1x1 conv as Co-column broadcast-FMA (Ci/Co too small for the MXU), bias + ReLU.
    y = jnp.zeros((N, Co, HW), jnp.float32)
    for ci in range(Ci):
        y = y + pw_ref[:, ci:ci + 1] * h[:, ci:ci + 1, :]   # (Co,1)*(N,1,HW) -> (N,Co,HW)
    y = jnp.maximum(y + pwb_ref[...], 0.0)

    # BatchNorm2d (training-mode forward): per-channel batch stats over (N, H, W), biased var.
    inv_cnt = 1.0 / float(N * HW)
    mean = jnp.sum(jnp.sum(y, axis=2, keepdims=True), axis=0, keepdims=True) * inv_cnt  # (1,Co,1)
    d = y - mean
    var = jnp.sum(jnp.sum(d * d, axis=2, keepdims=True), axis=0, keepdims=True) * inv_cnt
    inv = jax.lax.rsqrt(var + eps)
    o_ref[...] = (d * inv * g_ref[...] + b_ref[...]).astype(o_ref.dtype)


def sep_conv2d(x_nchw, dw, dwb, pw, pwb, gamma, beta, *, stride, pad, eps=1e-5):
    """NCHW in / NCHW out wrapper matching the PyTorch SepConv2d module (drop=None, bn=True)."""
    N, Ci, H, W = x_nchw.shape
    K = dw.shape[-1]
    Co = pw.shape[0]
    if stride != 1 or 2 * pad != K - 1:
        # TODO(synk): stride>1 / non-'same' padding needs a space-to-depth or 2-D strided-slice
        # depthwise path; only the (stride=1, 'same' padding) configuration is implemented.
        raise NotImplementedError("sep_conv2d fast path requires stride == 1 and 2*pad == K-1")
    HW = H * W
    L = (H + 2 * pad) * W + 2 * pad                      # flat halo length per (n, ci) plane

    # Free, contiguous reshapes only — no transposes, no HBM padding pass.
    x_flat = x_nchw.reshape(N, Ci, HW)
    dw2 = dw.reshape(Ci, K * K)                          # (Ci, 1, K, K) -> (Ci, K*K)
    pw2 = pw.reshape(Co, Ci)                             # (Co, Ci, 1, 1) -> (Co, Ci)
    col_ids = (jnp.arange(HW, dtype=jnp.int32) % W).reshape(1, 1, HW)

    # TODO(synk): at production sizes, tile over a grid with a two-pass BN (per-tile partial
    # sum/sumsq + finalize) so the working set fits v7x's 64 MiB VMEM and both TensorCores are
    # used; at this size a single fused step is launch-overhead optimal.
    y = pl.pallas_call(
        partial(sepconv_bn_kernel, K=K, pad=pad, H=H, W=W, eps=eps),
        out_shape=jax.ShapeDtypeStruct((N, Co, HW), jnp.float32),
        in_specs=[pl.BlockSpec(memory_space=pltpu.MemorySpace.VMEM)] * 8,
        out_specs=pl.BlockSpec(memory_space=pltpu.MemorySpace.VMEM),
        scratch_shapes=[pltpu.VMEM((N, Ci, L), jnp.float32)],
    )(x_flat, col_ids, dw2, dwb.reshape(Ci, 1), pw2,
      pwb.reshape(Co, 1), gamma.reshape(Co, 1), beta.reshape(Co, 1))

    return y.reshape(N, Co, H, W)


def reference(x, dw, dwb, pw, pwb, gamma, beta, *, stride, pad, eps=1e-5):
    """Pure-JAX reference matching the PyTorch module forward."""
    Ci = x.shape[1]
    y = jax.lax.conv_general_dilated(
        x, dw, window_strides=(stride, stride),
        padding=((pad, pad), (pad, pad)),
        dimension_numbers=("NCHW", "OIHW", "NCHW"),
        feature_group_count=Ci,
    ) + dwb.reshape(1, -1, 1, 1)
    y = jax.lax.conv_general_dilated(
        y, pw, window_strides=(1, 1), padding="VALID",
        dimension_numbers=("NCHW", "OIHW", "NCHW"),
    ) + pwb.reshape(1, -1, 1, 1)
    y = jnp.maximum(y, 0.0)
    mean = jnp.mean(y, axis=(0, 2, 3), keepdims=True)
    var = jnp.mean((y - mean) ** 2, axis=(0, 2, 3), keepdims=True)
    return (y - mean) / jnp.sqrt(var + eps) * gamma.reshape(1, -1, 1, 1) + beta.reshape(1, -1, 1, 1)


if __name__ == "__main__":
    # SepConv2d(ni=4, no=8, kernel=3, stride=1, pad=1, drop=None, bn=True, activ=ReLU)
    N, Ci, H, W = 2, 4, 16, 16
    Co, K, stride, pad = 8, 3, 1, 1

    key = jax.random.PRNGKey(0)
    k0, k1, k2, k3, k4 = jax.random.split(key, 5)
    x = jax.random.normal(k0, (N, Ci, H, W), jnp.float32)
    dw = jax.random.normal(k1, (Ci, 1, K, K), jnp.float32) * 0.2   # depthwise weight
    dwb = jax.random.normal(k2, (Ci,), jnp.float32) * 0.1           # depthwise bias
    pw = jax.random.normal(k3, (Co, Ci, 1, 1), jnp.float32) * 0.2   # pointwise weight
    pwb = jax.random.normal(k4, (Co,), jnp.float32) * 0.1           # pointwise bias
    gamma = jnp.ones((Co,), jnp.float32)                            # BatchNorm weight (default)
    beta = jnp.zeros((Co,), jnp.float32)                            # BatchNorm bias (default)

    out = sep_conv2d(x, dw, dwb, pw, pwb, gamma, beta, stride=stride, pad=pad)
    out = jax.block_until_ready(out)

    ref = reference(x, dw, dwb, pw, pwb, gamma, beta, stride=stride, pad=pad)
    err = float(jnp.max(jnp.abs(out - ref)))
    assert out.shape == (N, Co, H, W), out.shape
    assert err < 1e-3, f"max abs error too large: {err}"
    print("KERNEL_OK")
</pallas_src>

<mosaic_0001>
module attributes {stable_mosaic.version = 11 : i64} {
  func.func @sepconv_bn_kernel(%arg0: memref<2x4x256xf32, #tpu.memory_space<vmem>>, %arg1: memref<1x1x256xi32, #tpu.memory_space<vmem>>, %arg2: memref<4x9xf32, #tpu.memory_space<vmem>>, %arg3: memref<4x1xf32, #tpu.memory_space<vmem>>, %arg4: memref<8x4xf32, #tpu.memory_space<vmem>>, %arg5: memref<8x1xf32, #tpu.memory_space<vmem>>, %arg6: memref<8x1xf32, #tpu.memory_space<vmem>>, %arg7: memref<8x1xf32, #tpu.memory_space<vmem>>, %arg8: memref<2x8x256xf32, #tpu.memory_space<vmem>>, %arg9: memref<2x4x290xf32, #tpu.memory_space<vmem>>) attributes {dimension_semantics = [], scalar_prefetch = 0 : i64, scratch_operands = 1 : i64, tpu.core_type = #tpu.core_type<tc>} {
    %cst = arith.constant 0.000000e+00 : f32
    %0 = vector.broadcast %cst : f32 to vector<2x4x290xf32>
    %c0 = arith.constant 0 : index
    %c0_0 = arith.constant 0 : index
    %c0_1 = arith.constant 0 : index
    %1 = vector.load %arg9[%c0, %c0_0, %c0_1] : memref<2x4x290xf32, #tpu.memory_space<vmem>>, vector<2x4x290xf32>
    tpu.vector_store %arg9[%c0, %c0_0, %c0_1], %0 {strides = array<i32>} : memref<2x4x290xf32, #tpu.memory_space<vmem>>, vector<2x4x290xf32>,
    %c0_2 = arith.constant 0 : index
    %c0_3 = arith.constant 0 : index
    %c0_4 = arith.constant 0 : index
    %2 = vector.load %arg0[%c0_2, %c0_3, %c0_4] : memref<2x4x256xf32, #tpu.memory_space<vmem>>, vector<2x4x256xf32>
    %c0_5 = arith.constant 0 : index
    %c0_6 = arith.constant 0 : index
    %c17 = arith.constant 17 : index
    %3 = vector.load %arg9[%c0_5, %c0_6, %c17] : memref<2x4x290xf32, #tpu.memory_space<vmem>>, vector<2x4x256xf32>
    tpu.vector_store %arg9[%c0_5, %c0_6, %c17], %2 {strides = array<i32>} : memref<2x4x290xf32, #tpu.memory_space<vmem>>, vector<2x4x256xf32>,
    %c0_7 = arith.constant 0 : index
    %c0_8 = arith.constant 0 : index
    %c0_9 = arith.constant 0 : index
    %4 = vector.load %arg9[%c0_7, %c0_8, %c0_9] : memref<2x4x290xf32, #tpu.memory_space<vmem>>, vector<2x4x290xf32>
    %c0_10 = arith.constant 0 : index
    %c0_11 = arith.constant 0 : index
    %c0_12 = arith.constant 0 : index
    %5 = vector.load %arg1[%c0_10, %c0_11, %c0_12] : memref<1x1x256xi32, #tpu.memory_space<vmem>>, vector<1x1x256xi32>
    %cst_13 = arith.constant 0.000000e+00 : f32
    %6 = vector.broadcast %cst_13 : f32 to vector<2x4x256xf32>
    %7 = vector.extract_strided_slice %4 {offsets = [0, 0, 0], sizes = [2, 4, 256], strides = [1, 1, 1]} : vector<2x4x290xf32> to vector<2x4x256xf32>
    %c1_i32 = arith.constant 1 : i32
    %8 = vector.broadcast %c1_i32 : i32 to vector<1x1x256xi32>
    %9 = arith.cmpi sge, %5, %8 : vector<1x1x256xi32>
    %cst_14 = arith.constant 0.000000e+00 : f32
    %10 = vector.shape_cast %9 : vector<1x1x256xi1> to vector<1x1x256xi1>
    %11 = vector.broadcast %10 : vector<1x1x256xi1> to vector<2x4x256xi1>
    %12 = vector.broadcast %cst_14 : f32 to vector<2x4x256xf32>
    %13 = arith.select %11, %7, %12 : vector<2x4x256xi1>, vector<2x4x256xf32>
    %c0_15 = arith.constant 0 : index
    %c0_16 = arith.constant 0 : index
    %14 = vector.load %arg2[%c0_15, %c0_16] : memref<4x9xf32, #tpu.memory_space<vmem>>, vector<4x1xf32>
    %15 = vector.shape_cast %14 : vector<4x1xf32> to vector<1x4x1xf32>
    %16 = vector.broadcast %15 : vector<1x4x1xf32> to vector<2x4x256xf32>
    %17 = arith.mulf %13, %16 : vector<2x4x256xf32>
    %18 = arith.addf %6, %17 : vector<2x4x256xf32>
    %19 = vector.extract_strided_slice %4 {offsets = [0, 0, 1], sizes = [2, 4, 256], strides = [1, 1, 1]} : vector<2x4x290xf32> to vector<2x4x256xf32>
    %c0_17 = arith.constant 0 : index
    %c1 = arith.constant 1 : index
    %20 = vector.load %arg2[%c0_17, %c1] : memref<4x9xf32, #tpu.memory_space<vmem>>, vector<4x1xf32>
    %21 = vector.shape_cast %20 : vector<4x1xf32> to vector<1x4x1xf32>
    %22 = vector.broadcast %21 : vector<1x4x1xf32> to vector<2x4x256xf32>
    %23 = arith.mulf %19, %22 : vector<2x4x256xf32>
    %24 = arith.addf %18, %23 : vector<2x4x256xf32>
    %25 = vector.extract_strided_slice %4 {offsets = [0, 0, 2], sizes = [2, 4, 256], strides = [1, 1, 1]} : vector<2x4x290xf32> to vector<2x4x256xf32>
    %c15_i32 = arith.constant 15 : i32
    %26 = vector.broadcast %c15_i32 : i32 to vector<1x1x256xi32>
    %27 = arith.cmpi slt, %5, %26 : vector<1x1x256xi32>
    %cst_18 = arith.constant 0.000000e+00 : f32
    %28 = vector.shape_cast %27 : vector<1x1x256xi1> to vector<1x1x256xi1>
    %29 = vector.broadcast %28 : vector<1x1x256xi1> to vector<2x4x256xi1>
    %30 = vector.broadcast %cst_18 : f32 to vector<2x4x256xf32>
    %31 = arith.select %29, %25, %30 : vector<2x4x256xi1>, vector<2x4x256xf32>
    %c0_19 = arith.constant 0 : index
    %c2 = arith.constant 2 : index
    %32 = vector.load %arg2[%c0_19, %c2] : memref<4x9xf32, #tpu.memory_space<vmem>>, vector<4x1xf32>
    %33 = vector.shape_cast %32 : vector<4x1xf32> to vector<1x4x1xf32>
    %34 = vector.broadcast %33 : vector<1x4x1xf32> to vector<2x4x256xf32>
    %35 = arith.mulf %31, %34 : vector<2x4x256xf32>
    %36 = arith.addf %24, %35 : vector<2x4x256xf32>
    %37 = vector.extract_strided_slice %4 {offsets = [0, 0, 16], sizes = [2, 4, 256], strides = [1, 1, 1]} : vector<2x4x290xf32> to vector<2x4x256xf32>
    %c1_i32_20 = arith.constant 1 : i32
    %38 = vector.broadcast %c1_i32_20 : i32 to vector<1x1x256xi32>
    %39 = arith.cmpi sge, %5, %38 : vector<1x1x256xi32>
    %cst_21 = arith.constant 0.000000e+00 : f32
    %40 = vector.shape_cast %39 : vector<1x1x256xi1> to vector<1x1x256xi1>
    %41 = vector.broadcast %40 : vector<1x1x256xi1> to vector<2x4x256xi1>
    %42 = vector.broadcast %cst_21 : f32 to vector<2x4x256xf32>
    %43 = arith.select %41, %37, %42 : vector<2x4x256xi1>, vector<2x4x256xf32>
    %c0_22 = arith.constant 0 : index
    %c3 = arith.constant 3 : index
    %44 = vector.load %arg2[%c0_22, %c3] : memref<4x9xf32, #tpu.memory_space<vmem>>, vector<4x1xf32>
    %45 = vector.shape_cast %44 : vector<4x1xf32> to vector<1x4x1xf32>
    %46 = vector.broadcast %45 : vector<1x4x1xf32> to vector<2x4x256xf32>
    %47 = arith.mulf %43, %46 : vector<2x4x256xf32>
    %48 = arith.addf %36, %47 : vector<2x4x256xf32>
    %49 = vector.extract_strided_slice %4 {offsets = [0, 0, 17], sizes = [2, 4, 256], strides = [1, 1, 1]} : vector<2x4x290xf32> to vector<2x4x256xf32>
    %c0_23 = arith.constant 0 : index
    %c4 = arith.constant 4 : index
    %50 = vector.load %arg2[%c0_23, %c4] : memref<4x9xf32, #tpu.memory_space<vmem>>, vector<4x1xf32>
    %51 = vector.shape_cast %50 : vector<4x1xf32> to vector<1x4x1xf32>
    %52 = vector.broadcast %51 : vector<1x4x1xf32> to vector<2x4x256xf32>
    %53 = arith.mulf %49, %52 : vector<2x4x256xf32>
    %54 = arith.addf %48, %53 : vector<2x4x256xf32>
    %55 = vector.extract_strided_slice %4 {offsets = [0, 0, 18], sizes = [2, 4, 256], strides = [1, 1, 1]} : vector<2x4x290xf32> to vector<2x4x256xf32>
    %c15_i32_24 = arith.constant 15 : i32
    %56 = vector.broadcast %c15_i32_24 : i32 to vector<1x1x256xi32>
    %57 = arith.cmpi slt, %5, %56 : vector<1x1x256xi32>
    %cst_25 = arith.constant 0.000000e+00 : f32
    %58 = vector.shape_cast %57 : vector<1x1x256xi1> to vector<1x1x256xi1>
    %59 = vector.broadcast %58 : vector<1x1x256xi1> to vector<2x4x256xi1>
    %60 = vector.broadcast %cst_25 : f32 to vector<2x4x256xf32>
    %61 = arith.select %59, %55, %60 : vector<2x4x256xi1>, vector<2x4x256xf32>
    %c0_26 = arith.constant 0 : index
    %c5 = arith.constant 5 : index
    %62 = vector.load %arg2[%c0_26, %c5] : memref<4x9xf32, #tpu.memory_space<vmem>>, vector<4x1xf32>
    %63 = vector.shape_cast %62 : vector<4x1xf32> to vector<1x4x1xf32>
    %64 = vector.broadcast %63 : vector<1x4x1xf32> to vector<2x4x256xf32>
    %65 = arith.mulf %61, %64 : vector<2x4x256xf32>
    %66 = arith.addf %54, %65 : vector<2x4x256xf32>
    %67 = vector.extract_strided_slice %4 {offsets = [0, 0, 32], sizes = [2, 4, 256], strides = [1, 1, 1]} : vector<2x4x290xf32> to vector<2x4x256xf32>
    %c1_i32_27 = arith.constant 1 : i32
    %68 = vector.broadcast %c1_i32_27 : i32 to vector<1x1x256xi32>
    %69 = arith.cmpi sge, %5, %68 : vector<1x1x256xi32>
    %cst_28 = arith.constant 0.000000e+00 : f32
    %70 = vector.shape_cast %69 : vector<1x1x256xi1> to vector<1x1x256xi1>
    %71 = vector.broadcast %70 : vector<1x1x256xi1> to vector<2x4x256xi1>
    %72 = vector.broadcast %cst_28 : f32 to vector<2x4x256xf32>
    %73 = arith.select %71, %67, %72 : vector<2x4x256xi1>, vector<2x4x256xf32>
    %c0_29 = arith.constant 0 : index
    %c6 = arith.constant 6 : index
    %74 = vector.load %arg2[%c0_29, %c6] : memref<4x9xf32, #tpu.memory_space<vmem>>, vector<4x1xf32>
    %75 = vector.shape_cast %74 : vector<4x1xf32> to vector<1x4x1xf32>
    %76 = vector.broadcast %75 : vector<1x4x1xf32> to vector<2x4x256xf32>
    %77 = arith.mulf %73, %76 : vector<2x4x256xf32>
    %78 = arith.addf %66, %77 : vector<2x4x256xf32>
    %79 = vector.extract_strided_slice %4 {offsets = [0, 0, 33], sizes = [2, 4, 256], strides = [1, 1, 1]} : vector<2x4x290xf32> to vector<2x4x256xf32>
    %c0_30 = arith.constant 0 : index
    %c7 = arith.constant 7 : index
    %80 = vector.load %arg2[%c0_30, %c7] : memref<4x9xf32, #tpu.memory_space<vmem>>, vector<4x1xf32>
    %81 = vector.shape_cast %80 : vector<4x1xf32> to vector<1x4x1xf32>
    %82 = vector.broadcast %81 : vector<1x4x1xf32> to vector<2x4x256xf32>
    %83 = arith.mulf %79, %82 : vector<2x4x256xf32>
    %84 = arith.addf %78, %83 : vector<2x4x256xf32>
    %85 = vector.extract_strided_slice %4 {offsets = [0, 0, 34], sizes = [2, 4, 256], strides = [1, 1, 1]} : vector<2x4x290xf32> to vector<2x4x256xf32>
    %c15_i32_31 = arith.constant 15 : i32
    %86 = vector.broadcast %c15_i32_31 : i32 to vector<1x1x256xi32>
    %87 = arith.cmpi slt, %5, %86 : vector<1x1x256xi32>
    %cst_32 = arith.constant 0.000000e+00 : f32
    %88 = vector.shape_cast %87 : vector<1x1x256xi1> to vector<1x1x256xi1>
    %89 = vector.broadcast %88 : vector<1x1x256xi1> to vector<2x4x256xi1>
    %90 = vector.broadcast %cst_32 : f32 to vector<2x4x256xf32>
    %91 = arith.select %89, %85, %90 : vector<2x4x256xi1>, vector<2x4x256xf32>
    %c0_33 = arith.constant 0 : index
    %c8 = arith.constant 8 : index
    %92 = vector.load %arg2[%c0_33, %c8] : memref<4x9xf32, #tpu.memory_space<vmem>>, vector<4x1xf32>
    %93 = vector.shape_cast %92 : vector<4x1xf32> to vector<1x4x1xf32>
    %94 = vector.broadcast %93 : vector<1x4x1xf32> to vector<2x4x256xf32>
    %95 = arith.mulf %91, %94 : vector<2x4x256xf32>
    %96 = arith.addf %84, %95 : vector<2x4x256xf32>
    %c0_34 = arith.constant 0 : index
    %c0_35 = arith.constant 0 : index
    %97 = vector.load %arg3[%c0_34, %c0_35] : memref<4x1xf32, #tpu.memory_space<vmem>>, vector<4x1xf32>
    %98 = vector.shape_cast %97 : vector<4x1xf32> to vector<1x4x1xf32>
    %99 = vector.broadcast %98 : vector<1x4x1xf32> to vector<2x4x256xf32>
    %100 = arith.addf %96, %99 : vector<2x4x256xf32>
    %cst_36 = arith.constant 0.000000e+00 : f32
    %101 = vector.broadcast %cst_36 : f32 to vector<2x8x256xf32>
    %c0_37 = arith.constant 0 : index
    %c0_38 = arith.constant 0 : index
    %102 = vector.load %arg4[%c0_37, %c0_38] : memref<8x4xf32, #tpu.memory_space<vmem>>, vector<8x1xf32>
    %103 = vector.extract_strided_slice %100 {offsets = [0, 0, 0], sizes = [2, 1, 256], strides = [1, 1, 1]} : vector<2x4x256xf32> to vector<2x1x256xf32>
    %104 = vector.shape_cast %102 : vector<8x1xf32> to vector<1x8x1xf32>
    %105 = vector.broadcast %104 : vector<1x8x1xf32> to vector<2x8x256xf32>
    %106 = vector.broadcast %103 : vector<2x1x256xf32> to vector<2x8x256xf32>
    %107 = arith.mulf %105, %106 : vector<2x8x256xf32>
    %108 = arith.addf %101, %107 : vector<2x8x256xf32>
    %c0_39 = arith.constant 0 : index
    %c1_40 = arith.constant 1 : index
    %109 = vector.load %arg4[%c0_39, %c1_40] : memref<8x4xf32, #tpu.memory_space<vmem>>, vector<8x1xf32>
    %110 = vector.extract_strided_slice %100 {offsets = [0, 1, 0], sizes = [2, 1, 256], strides = [1, 1, 1]} : vector<2x4x256xf32> to vector<2x1x256xf32>
    %111 = vector.shape_cast %109 : vector<8x1xf32> to vector<1x8x1xf32>
    %112 = vector.broadcast %111 : vector<1x8x1xf32> to vector<2x8x256xf32>
    %113 = vector.broadcast %110 : vector<2x1x256xf32> to vector<2x8x256xf32>
    %114 = arith.mulf %112, %113 : vector<2x8x256xf32>
    %115 = arith.addf %108, %114 : vector<2x8x256xf32>
    %c0_41 = arith.constant 0 : index
    %c2_42 = arith.constant 2 : index
    %116 = vector.load %arg4[%c0_41, %c2_42] : memref<8x4xf32, #tpu.memory_space<vmem>>, vector<8x1xf32>
    %117 = vector.extract_strided_slice %100 {offsets = [0, 2, 0], sizes = [2, 1, 256], strides = [1, 1, 1]} : vector<2x4x256xf32> to vector<2x1x256xf32>
    %118 = vector.shape_cast %116 : vector<8x1xf32> to vector<1x8x1xf32>
    %119 = vector.broadcast %118 : vector<1x8x1xf32> to vector<2x8x256xf32>
    %120 = vector.broadcast %117 : vector<2x1x256xf32> to vector<2x8x256xf32>
    %121 = arith.mulf %119, %120 : vector<2x8x256xf32>
    %122 = arith.addf %115, %121 : vector<2x8x256xf32>
    %c0_43 = arith.constant 0 : index
    %c3_44 = arith.constant 3 : index
    %123 = vector.load %arg4[%c0_43, %c3_44] : memref<8x4xf32, #tpu.memory_space<vmem>>, vector<8x1xf32>
    %124 = vector.extract_strided_slice %100 {offsets = [0, 3, 0], sizes = [2, 1, 256], strides = [1, 1, 1]} : vector<2x4x256xf32> to vector<2x1x256xf32>
    %125 = vector.shape_cast %123 : vector<8x1xf32> to vector<1x8x1xf32>
    %126 = vector.broadcast %125 : vector<1x8x1xf32> to vector<2x8x256xf32>
    %127 = vector.broadcast %124 : vector<2x1x256xf32> to vector<2x8x256xf32>
    %128 = arith.mulf %126, %127 : vector<2x8x256xf32>
    %129 = arith.addf %122, %128 : vector<2x8x256xf32>
    %c0_45 = arith.constant 0 : index
    %c0_46 = arith.constant 0 : index
    %130 = vector.load %arg5[%c0_45, %c0_46] : memref<8x1xf32, #tpu.memory_space<vmem>>, vector<8x1xf32>
    %131 = vector.shape_cast %130 : vector<8x1xf32> to vector<1x8x1xf32>
    %132 = vector.broadcast %131 : vector<1x8x1xf32> to vector<2x8x256xf32>
    %133 = arith.addf %129, %132 : vector<2x8x256xf32>
    %cst_47 = arith.constant 0.000000e+00 : f32
    %134 = vector.broadcast %cst_47 : f32 to vector<2x8x256xf32>
    %135 = arith.maximumf %133, %134 : vector<2x8x256xf32>
    %cst_48 = arith.constant dense<0.000000e+00> : vector<2x8xf32>
    %136 = vector.multi_reduction <add>, %135, %cst_48 [2] : vector<2x8x256xf32> to vector<2x8xf32>
    %137 = vector.shape_cast %136 : vector<2x8xf32> to vector<2x8x1xf32>
    %cst_49 = arith.constant dense<0.000000e+00> : vector<8x1xf32>
    %138 = vector.multi_reduction <add>, %137, %cst_49 [0] : vector<2x8x1xf32> to vector<8x1xf32>
    %139 = vector.shape_cast %138 : vector<8x1xf32> to vector<1x8x1xf32>
    %cst_50 = arith.constant 0.001953125 : f32
    %140 = vector.broadcast %cst_50 : f32 to vector<1x8x1xf32>
    %141 = arith.mulf %139, %140 : vector<1x8x1xf32>
    %142 = vector.broadcast %141 : vector<1x8x1xf32> to vector<2x8x256xf32>
    %143 = arith.subf %135, %142 : vector<2x8x256xf32>
    %144 = arith.mulf %143, %143 : vector<2x8x256xf32>
    %cst_51 = arith.constant dense<0.000000e+00> : vector<2x8xf32>
    %145 = vector.multi_reduction <add>, %144, %cst_51 [2] : vector<2x8x256xf32> to vector<2x8xf32>
    %146 = vector.shape_cast %145 : vector<2x8xf32> to vector<2x8x1xf32>
    %cst_52 = arith.constant dense<0.000000e+00> : vector<8x1xf32>
    %147 = vector.multi_reduction <add>, %146, %cst_52 [0] : vector<2x8x1xf32> to vector<8x1xf32>
    %148 = vector.shape_cast %147 : vector<8x1xf32> to vector<1x8x1xf32>
    %cst_53 = arith.constant 0.001953125 : f32
    %149 = vector.broadcast %cst_53 : f32 to vector<1x8x1xf32>
    %150 = arith.mulf %148, %149 : vector<1x8x1xf32>
    %cst_54 = arith.constant 9.99999974E-6 : f32
    %151 = vector.broadcast %cst_54 : f32 to vector<1x8x1xf32>
    %152 = arith.addf %150, %151 : vector<1x8x1xf32>
    %153 = math.rsqrt %152 : vector<1x8x1xf32>
    %154 = vector.broadcast %153 : vector<1x8x1xf32> to vector<2x8x256xf32>
    %155 = arith.mulf %143, %154 : vector<2x8x256xf32>
    %c0_55 = arith.constant 0 : index
    %c0_56 = arith.constant 0 : index
    %156 = vector.load %arg6[%c0_55, %c0_56] : memref<8x1xf32, #tpu.memory_space<vmem>>, vector<8x1xf32>
    %157 = vector.shape_cast %156 : vector<8x1xf32> to vector<1x8x1xf32>
    %158 = vector.broadcast %157 : vector<1x8x1xf32> to vector<2x8x256xf32>
    %159 = arith.mulf %155, %158 : vector<2x8x256xf32>
    %c0_57 = arith.constant 0 : index
    %c0_58 = arith.constant 0 : index
    %160 = vector.load %arg7[%c0_57, %c0_58] : memref<8x1xf32, #tpu.memory_space<vmem>>, vector<8x1xf32>
    %161 = vector.shape_cast %160 : vector<8x1xf32> to vector<1x8x1xf32>
    %162 = vector.broadcast %161 : vector<1x8x1xf32> to vector<2x8x256xf32>
    %163 = arith.addf %159, %162 : vector<2x8x256xf32>
    %c0_59 = arith.constant 0 : index
    %c0_60 = arith.constant 0 : index
    %c0_61 = arith.constant 0 : index
    %164 = vector.load %arg8[%c0_59, %c0_60, %c0_61] : memref<2x8x256xf32, #tpu.memory_space<vmem>>, vector<2x8x256xf32>
    tpu.vector_store %arg8[%c0_59, %c0_60, %c0_61], %163 {strides = array<i32>} : memref<2x8x256xf32, #tpu.memory_space<vmem>>, vector<2x8x256xf32>,
    return
  }
}

</mosaic_0001>

<bundles_post_ra>
// kernel: tpu_custom_call.1
= control target key start
LH: loop header
LB: loop body
LE: loop exit
PB: predicated region body
PF: predicated region fallthrough
CT: control target
= control target key end

     0   :  { %v721_v2 = vmov 1   ;;  %s722_s9 = smov 17   ;;  %v723_v4 = vmov 7   ;;  %vm31_vm0 = vcmask 273408   ;;  %v724_v6 = vmov 0.0   ;;  %s1184_s0 = inlined_call_operand.vmem [shape: f32[2,4,256], index: 0, kind: input, shape index: {}]   ;;  %s1185_s1 = inlined_call_operand.vmem [shape: s32[1,1,256], index: 1, kind: input, shape index: {}]   ;;  %s1186_s2 = inlined_call_operand.vmem [shape: f32[4,9], index: 2, kind: input, shape index: {}]   ;;  %s1187_s3 = inlined_call_operand.vmem [shape: f32[4,1], index: 3, kind: input, shape index: {}]   ;;  %s1188_s4 = inlined_call_operand.vmem [shape: f32[8,4], index: 4, kind: input, shape index: {}]   ;;  %s1189_s5 = inlined_call_operand.vmem [shape: f32[8,1], index: 5, kind: input, shape index: {}]   ;;  %s1190_s6 = inlined_call_operand.vmem [shape: f32[8,1], index: 6, kind: input, shape index: {}]   ;;  %s1191_s7 = inlined_call_operand.vmem [shape: f32[8,1], index: 7, kind: input, shape index: {}]   ;;  %s1192_s8 = inlined_call_operand.hbm [shape: f32[2,8,256], index: 8, kind: output, shape index: {}]  }
   0x1   :  { %v35_v0 = vld [vmem:[%s1184_s0] sm:$0xff]  ;;  %679 = vset.pattern.permute.xlu1 %v721_v2  ;;  %v36_v3 = vld [vmem:[%s1184_s0 + $0x8] sm:$0xff]  ;;  %681 = vset.pattern.permute.xlu0 %v723_v4  ;;  %30 = vst [vmem:[#allocation2] sm:$0xff] %v724_v6  ;;  %32 = vst.msk [vmem:[#allocation2 + $0x8] sm:$0xf] %vm31_vm0, %v724_v6  ;;  %v725_v7 = vmov 4  }
   0x2   :  { %v87_v1 = vld [vmem:[%s1186_s2] sm:$0xf]  ;;  %39 = vrot.lane.b32.xlu0 %v35_v0, %s722_s9  ;;  %33 = vst [vmem:[#allocation2 + $0xc] sm:$0xff] %v724_v6  ;;  %34 = vst.msk [vmem:[#allocation2 + $0x14] sm:$0xf] %vm31_vm0, %v724_v6 }
   0x3   :  { %102 = vperm.xlu1 %679, %v87_v1   ;;  %v225_v5 = vld [vmem:[%s1186_s2] sm:$0xf] }
   0x4   :  { %v349_v8 = vld [vmem:[%s1186_s2] sm:$0xf] }
   0x6   :  { %41 = vrot.lane.b32.xlu0 %v36_v3, %s722_s9 }
   0x7   :  { %680 = vset.pattern.permute.xlu1 %v725_v7 }
   0x8   :  { %13 = vsyncpa [#allocation4], 0  ;;  %240 = vperm.xlu1 %680, %v225_v5   ;;  %v726_v9 = vmov 0   ;;  %v727_v10 = vmov 3   ;;  %v186_v11 = vld [vmem:[%s1186_s2] sm:$0xf]  ;;  %v67_v20 = vlaneseq }
   0x9   :  { %v728_v12 = vmov 2   ;;  %v310_v13 = vld [vmem:[%s1186_s2] sm:$0xf]  ;;  %v729_v14 = vmov 5   ;;  %v730_v15 = vmov 6   ;;  %v731_v17 = vmov 8  }
   0xa   :  { %364 = vperm.xlu0 %681, %v349_v8   ;;  %v434_v16 = vld [vmem:[%s1186_s2] sm:$0xf]  ;;  %vm52_vm1 = vcmask 1043592   ;;  %vm53_vm2 = vcmask 1047556   ;;  %vm45_vm3 = vcmask 138240   ;;  %vm56_vm4 = vcmask 134144  }
   0xb   :  { %vm54_vm5 = vmor %vm53_vm2, %vm52_vm1  ;;  %v822_v24 = vld [vmem:[%s1185_s1] sm:$0x3]  ;;  %v824_v25 = vshrl.u32 %v67_v20, 7  ;;  %s732_s22 = smov 126   ;;  %s733_s1 = smov 112   ;;  %vm297_vm10 = vcmask 900096  }
   0xc   :  { %682 = vset.pattern.permute.xlu1 %v726_v9  ;;  %vm65_vm6 = vcmp.ge.s32.totalorder %v822_v24, 1  ;;  %s734_s23 = smov 110   ;;  %s735_s24 = smov 96   ;;  %v737_v51 = vmov 839922192   ;;  %vm147_vm9 = vcmp.lt.s32.totalorder %v822_v24, 15 }
   0xd   :  { %90 = vperm.xlu1 %682, %v87_v1   ;;  %1199 = vst [vmem:[#allocation6_spill] sm:$0xff] %v824_v25  ;;  %v828_v28 = vsub.s32 0, %v824_v25  ;;  %v831_v29 = vsub.s32 1, %v824_v25  ;;  %v66_v31 = vsel %vm65_vm6, 1, %v726_v9  ;;  %s736_s25 = smov 94   ;;  %v105_v52 = vunpack.c.l.s4 %v737_v51  ;;  %s738_s26 = smov 127  }
   0xe   :  { %684 = vset.pattern.permute.xlu0 %v727_v10  ;;  %s739_s27 = smov 111   ;;  %s740_s28 = smov 95   ;;  %v148_v51 = vsel %vm147_vm9, 1, %v726_v9  ;;  %vm421_vm12 = vcmask 769024   ;;  %vm173_vm13 = vcmask 1031168   ;;  %vm212_vm14 = vcmask 916480  }
   0xf   :  { %228 = vperm.xlu0 %684, %v225_v5   ;;  %1200 = vst [vmem:[#allocation7_spill] sm:$0xff] %v828_v28  ;;  %1201 = vst [vmem:[#allocation8_spill] sm:$0xff] %v831_v29  ;;  %v70_v34 = vrot.slane %v66_v31, %v828_v28  ;;  %v74_v35 = vrot.slane %v66_v31, %v831_v29  ;;  %v106_v53 = vunpack.c.0.s8 %v105_v52  ;;  %vm134_vm15 = vcmask 1039360  }
  0x10   :  { %vm336_vm1 = vcmask 785408   ;;  %vm272_vm2 = vcmask 908288  }
  0x11   :  { %683 = vset.pattern.permute.xlu1 %v728_v12  ;;  %vm854_vm7 = vcmp.eq.s32.totalorder %v70_v34, 1  ;;  %vm858_vm8 = vcmp.eq.s32.totalorder %v74_v35, 1  ;;  %v109_v54 = vsub.s32 %v106_v53, %v824_v25 }
  0x12   :  { %189 = vperm.xlu1 %683, %v186_v11  }
  0x13   :  { %685 = vset.pattern.permute.xlu0 %v729_v14  ;;  %v448_v14 = vld [vmem:[%s1187_s3] sm:$0xf] }
  0x14   :  { %313 = vperm.xlu0 %685, %v310_v13  }
  0x16   :  { %686 = vset.pattern.permute.xlu1 %v730_v15 }
  0x17   :  { %352 = vperm.xlu1 %686, %v349_v8  }
  0x18   :  { %688 = vset.pattern.permute.xlu0 %v726_v9 }
  0x1b   :  { %687 = vset.pattern.permute.xlu1 %v731_v17  ;;  %v458_v17 = vld [vmem:[%s1188_s4] sm:$0xff] }
  0x1c   :  { %437 = vperm.xlu1 %687, %v434_v16  }
  0x20   :  { %689 = vset.pattern.permute.xlu1 %v726_v9 }
  0x74   :  { %v40_v18 = vpop.permute.xlu0 %39 }
  0x75   :  { %v43_v19 = vrot.slane %v40_v18, 4 }
  0x77   :  { %v46_v21 = vsel %vm45_vm3, %v43_v19, %v40_v18  ;;  %57 = vst.msk [vmem:[#allocation2 + $0x8] sm:$0xf] %vm56_vm4, %v43_v19 }
  0x78   :  { %55 = vst.msk [vmem:[#allocation2] sm:$0xff] %vm54_vm5, %v46_v21  ;;  %v42_v22 = vpop.permute.xlu0 %41 }
  0x79   :  { %v44_v23 = vrot.slane %v42_v22, 4 }
  0x7b   :  { %v47_v26 = vsel %vm45_vm3, %v44_v23, %v42_v22  ;;  %59 = vst.msk [vmem:[#allocation2 + $0x14] sm:$0xf] %vm56_vm4, %v44_v23  ;;  %vm396_vm3 = vcmask 777216  }
  0x7c   :  { %58 = vst.msk [vmem:[#allocation2 + $0xc] sm:$0xff] %vm54_vm5, %v47_v26  ;;  %v572_v26 = vld [vmem:[%s1189_s5] sm:$0xff] }
  0x7e   :  { %v103_v27 = vpop.permute.xlu1 %102  ;;  %v833_v30 = vld [vmem:[#allocation2 + $0x8] sm:$0xf] }
  0x7f   :  { %165 = vrot.lane.b32.xlu0 %v833_v30, %s732_s22  ;;  %v840_v33 = vld [vmem:[#allocation2] sm:$0xff]  ;;  %v110_v55 = vrot.slane %v103_v27, %v109_v54 }
  0x80   :  { %v79_v39 = vcombine.high %v840_v33, %v840_v33  ;;  %v83_v47 = vsel %vm854_vm7, %v840_v33, 0.0 }
  0x81   :  { %v112_v56 = vmul.f32 %v110_v55, %v840_v33  ;;  %v113_v58 = vmul.f32 %v110_v55, %v833_v30 }
  0x82   :  { %v838_v32 = vld [vmem:[#allocation2 + $0x14] sm:$0xf]  ;;  %v84_v48 = vsel %vm858_vm8, %v79_v39, 0.0 }
  0x83   :  { %v241_v36 = vpop.permute.xlu1 %240  ;;  %171 = vrot.lane.b32.xlu1 %v838_v32, %s732_s22  ;;  %204 = vrot.lane.b32.xlu0 %v833_v30, %s733_s1  ;;  %v848_v37 = vld [vmem:[#allocation2 + $0xc] sm:$0xff]  ;;  %v115_v1 = vmul.f32 %v110_v55, %v838_v32  ;;  %v120_v15 = vcombine.high %v112_v56, %v112_v56 }
  0x84   :  { %v80_v38 = vcombine.high %v848_v37, %v848_v37  ;;  %v85_v43 = vsel %vm854_vm7, %v848_v37, 0.0  ;;  %v248_v57 = vrot.slane %v241_v36, %v109_v54  ;;  %v114_v63 = vmul.f32 %v110_v55, %v848_v37 }
  0x85   :  { %v365_v60 = vpop.permute.xlu0 %364 }
  0x86   :  { %v86_v44 = vsel %vm858_vm8, %v80_v38, 0.0  ;;  %v252_v59 = vmul.f32 %v248_v57, %v848_v37  ;;  %v372_v61 = vrot.slane %v365_v60, %v109_v54  ;;  %v253_v62 = vmul.f32 %v248_v57, %v838_v32 }
  0x87   :  { %210 = vrot.lane.b32.xlu1 %v838_v32, %s733_s1  ;;  %295 = vrot.lane.b32.xlu0 %v838_v32, %s734_s23  ;;  %v250_v4 = vmul.f32 %v248_v57, %v840_v33  ;;  %v121_v5 = vcombine.high %v114_v63, %v114_v63  ;;  %v251_v6 = vmul.f32 %v248_v57, %v833_v30 }
  0x88   :  { %v91_v42 = vpop.permute.xlu1 %90  ;;  %v374_v0 = vmul.f32 %v372_v61, %v840_v33  ;;  %v375_v3 = vmul.f32 %v372_v61, %v833_v30  ;;  %v376_v8 = vmul.f32 %v372_v61, %v848_v37  ;;  %v377_v13 = vmul.f32 %v372_v61, %v838_v32 }
  0x89   :  { %v871_v45 = vmul.f32 %v91_v42, %v85_v43  ;;  %v873_v46 = vmul.f32 %v91_v42, %v86_v44  ;;  %v880_v49 = vmul.f32 %v91_v42, %v83_v47  ;;  %v882_v50 = vmul.f32 %v91_v42, %v84_v48 }
  0x8a   :  { %v258_v7 = vcombine.high %v250_v4, %v250_v4  ;;  %v383_v11 = vcombine.high %v376_v8, %v376_v8  ;;  %v259_v16 = vcombine.high %v252_v59, %v252_v59  ;;  %v382_v18 = vcombine.high %v374_v0, %v374_v0  ;;  %v959_v20 = vpop.permute.xlu0 %228 }
  0x8b   :  { %289 = vrot.lane.b32.xlu1 %v833_v30, %s734_s23  ;;  %334 = vrot.lane.b32.xlu0 %v838_v32, %s735_s24  ;;  %v156_v54 = vrot.slane %v148_v51, %v831_v29 }
  0x8d   :  { %v956_v19 = vpop.permute.xlu1 %189  ;;  %vm996_vm11 = vcmp.eq.s32.totalorder %v156_v54, 1 }
  0x8f   :  { %328 = vrot.lane.b32.xlu1 %v833_v30, %s735_s24  ;;  %413 = vrot.lane.b32.xlu0 %v833_v30, %s736_s25  ;;  %v964_v22 = vpop.permute.xlu0 %313 }
  0x92   :  { %v961_v21 = vpop.permute.xlu1 %352 }
  0x93   :  { %419 = vrot.lane.b32.xlu1 %v838_v32, %s736_s25  ;;  %200 = vrot.lane.b32.xlu0 %v840_v33, %s733_s1 }
  0x97   :  { %291 = vrot.lane.b32.xlu0 %v848_v37, %s734_s23  ;;  %161 = vrot.lane.b32.xlu1 %v840_v33, %s732_s22  ;;  %v966_v23 = vpop.permute.xlu1 %437 }
  0x9b   :  { %330 = vrot.lane.b32.xlu0 %v848_v37, %s735_s24  ;;  %167 = vrot.lane.b32.xlu1 %v848_v37, %s732_s22 }
  0x9f   :  { %409 = vrot.lane.b32.xlu0 %v840_v33, %s736_s25  ;;  %206 = vrot.lane.b32.xlu1 %v848_v37, %s733_s1 }
  0xa3   :  { %169 = vrot.lane.b32.xlu0 %v80_v38, %s732_s22  ;;  %285 = vrot.lane.b32.xlu1 %v840_v33, %s734_s23 }
  0xa7   :  { %208 = vrot.lane.b32.xlu0 %v80_v38, %s733_s1  ;;  %324 = vrot.lane.b32.xlu1 %v840_v33, %s735_s24 }
  0xab   :  { %415 = vrot.lane.b32.xlu1 %v848_v37, %s736_s25  ;;  %287 = vrot.lane.b32.xlu0 %v79_v39, %s734_s23 }
  0xaf   :  { %326 = vrot.lane.b32.xlu0 %v79_v39, %s735_s24  ;;  %163 = vrot.lane.b32.xlu1 %v79_v39, %s732_s22 }
  0xb3   :  { %417 = vrot.lane.b32.xlu0 %v80_v38, %s736_s25  ;;  %202 = vrot.lane.b32.xlu1 %v79_v39, %s733_s1 }
  0xb7   :  { %122 = vrot.lane.b32.xlu0 %v112_v56, %s738_s26  ;;  %293 = vrot.lane.b32.xlu1 %v80_v38, %s734_s23 }
  0xbb   :  { %126 = vrot.lane.b32.xlu0 %v113_v58, %s738_s26  ;;  %332 = vrot.lane.b32.xlu1 %v80_v38, %s735_s24 }
  0xbf   :  { %266 = vrot.lane.b32.xlu0 %v252_v59, %s739_s27  ;;  %411 = vrot.lane.b32.xlu1 %v79_v39, %s736_s25 }
  0xc3   :  { %270 = vrot.lane.b32.xlu0 %v253_v62, %s739_s27  ;;  %128 = vrot.lane.b32.xlu1 %v114_v63, %s738_s26 }
  0xc7   :  { %384 = vrot.lane.b32.xlu0 %v374_v0, %s740_s28  ;;  %132 = vrot.lane.b32.xlu1 %v115_v1, %s738_s26 }
  0xcb   :  { %388 = vrot.lane.b32.xlu0 %v375_v3, %s740_s28  ;;  %260 = vrot.lane.b32.xlu1 %v250_v4, %s739_s27 }
  0xcf   :  { %130 = vrot.lane.b32.xlu0 %v121_v5, %s738_s26  ;;  %264 = vrot.lane.b32.xlu1 %v251_v6, %s739_s27 }
  0xd3   :  { %262 = vrot.lane.b32.xlu0 %v258_v7, %s739_s27  ;;  %390 = vrot.lane.b32.xlu1 %v376_v8, %s740_s28 }
  0xd7   :  { %392 = vrot.lane.b32.xlu0 %v383_v11, %s740_s28  ;;  %394 = vrot.lane.b32.xlu1 %v377_v13, %s740_s28 }
  0xdb   :  { %124 = vrot.lane.b32.xlu1 %v120_v15, %s738_s26  ;;  %451 = vperm.xlu0 %688, %v448_v14  }
  0xdf   :  { %268 = vrot.lane.b32.xlu1 %v259_v16, %s739_s27  ;;  %691 = vset.pattern.permute.xlu0 %v728_v12 }
  0xe0   :  { %517 = vperm.xlu0 %691, %v458_v17  }
  0xe3   :  { %386 = vrot.lane.b32.xlu1 %v382_v18, %s740_s28 }
  0xe4   :  { %694 = vset.pattern.permute.xlu0 %v726_v9 }
  0xe7   :  { %461 = vperm.xlu1 %689, %v458_v17  }
  0xeb   :  { %690 = vset.pattern.permute.xlu1 %v721_v2 }
  0xec   :  { %489 = vperm.xlu1 %690, %v458_v17  }
  0xf0   :  { %692 = vset.pattern.permute.xlu1 %v727_v10 }
  0xf1   :  { %v969_v12 = vpop.permute.xlu0 %165  ;;  %545 = vperm.xlu1 %692, %v458_v17  }
  0xf5   :  { %v172_v27 = vpop.permute.xlu1 %171  ;;  %v974_v30 = vpop.permute.xlu0 %204  ;;  %693 = vset.pattern.permute.xlu1 %v726_v9 }
  0xf6   :  { %575 = vperm.xlu1 %693, %v572_v26  }
  0xf9   :  { %v211_v2 = vpop.permute.xlu1 %210  ;;  %v296_v31 = vpop.permute.xlu0 %295 }
  0xfd   :  { %v290_v32 = vpop.permute.xlu1 %289  ;;  %v977_v33 = vpop.permute.xlu0 %334 }
 0x101   :  { %v979_v34 = vpop.permute.xlu1 %328  ;;  %v414_v10 = vpop.permute.xlu0 %413 }
 0x105   :  { %v420_v35 = vpop.permute.xlu1 %419  ;;  %v981_v36 = vpop.permute.xlu0 %200 }
 0x109   :  { %v983_v37 = vpop.permute.xlu0 %291  ;;  %v985_v38 = vpop.permute.xlu1 %161 }
 0x10d   :  { %v987_v39 = vpop.permute.xlu0 %330  ;;  %v168_v42 = vpop.permute.xlu1 %167 }
 0x111   :  { %v989_v43 = vpop.permute.xlu0 %409  ;;  %v207_v44 = vpop.permute.xlu1 %206 }
 0x115   :  { %v170_v47 = vpop.permute.xlu0 %169  ;;  %v286_v48 = vpop.permute.xlu1 %285 }
 0x119   :  { %v209_v52 = vpop.permute.xlu0 %208  ;;  %v325_v53 = vpop.permute.xlu1 %324 }
 0x11d   :  { %v994_v55 = vpop.permute.xlu1 %415  ;;  %v288_v56 = vpop.permute.xlu0 %287 }
 0x11e   :  { %v299_v58 = vsel %vm297_vm10, %v288_v56, %v290_v32 }
 0x11f   :  { %v307_v24 = vsel %vm996_vm11, %v299_v58, 0.0 }
 0x120   :  { %v1004_v59 = vmul.f32 %v964_v22, %v307_v24  ;;  %v152_v24 = vrot.slane %v148_v51, %v828_v28  ;;  %v176_v51 = vsel %vm173_vm13, %v168_v42, %v170_v47  ;;  %v298_v28 = vsel %vm297_vm10, %v286_v48, %v288_v56 }
 0x121   :  { %v327_v9 = vpop.permute.xlu0 %326  ;;  %v164_v60 = vpop.permute.xlu1 %163 }
 0x122   :  { %vm1058_vm0 = vcmp.eq.s32.totalorder %v152_v24, 1  ;;  %v338_v48 = vsel %vm336_vm1, %v327_v9, %v979_v34 }
 0x123   :  { %v306_v42 = vsel %vm1058_vm0, %v298_v28, 0.0 }
 0x124   :  { %v316_v34 = vmul.f32 %v964_v22, %v306_v42 }
 0x125   :  { %v1006_v61 = vpop.permute.xlu0 %417  ;;  %v203_v62 = vpop.permute.xlu1 %202 }
 0x126   :  { %v425_v63 = vsel %vm421_vm12, %v1006_v61, %v420_v35  ;;  %v177_v35 = vsel %vm173_vm13, %v170_v47, %v172_v27  ;;  %v174_v47 = vsel %vm173_vm13, %v985_v38, %v164_v60  ;;  %v213_v28 = vsel %vm212_vm14, %v981_v36, %v203_v62 }
 0x127   :  { %v433_v0 = vsel %vm996_vm11, %v425_v63, 0.0  ;;  %v185_v63 = vsel %vm996_vm11, %v177_v35, 0.0  ;;  %v215_v35 = vsel %vm212_vm14, %v207_v44, %v209_v52  ;;  %v337_v44 = vsel %vm336_vm1, %v325_v53, %v327_v9 }
 0x128   :  { %v1013_v1 = vmul.f32 %v966_v23, %v433_v0  ;;  %v214_v53 = vsel %vm212_vm14, %v203_v62, %v974_v30  ;;  %v346_v9 = vsel %vm858_vm8, %v338_v48, 0.0  ;;  %v424_v30 = vsel %vm421_vm12, %v994_v55, %v1006_v61 }
 0x129   :  { %v1015_v3 = vpop.permute.xlu0 %122  ;;  %v294_v4 = vpop.permute.xlu1 %293  ;;  %v221_v62 = vsel %vm854_vm7, %v213_v28, 0.0 }
 0x12a   :  { %v301_v5 = vsel %vm297_vm10, %v294_v4, %v296_v31 }
 0x12b   :  { %v309_v6 = vsel %vm996_vm11, %v301_v5, 0.0 }
 0x12c   :  { %v1021_v7 = vmul.f32 %v964_v22, %v309_v6 }
 0x12d   :  { %v1023_v8 = vpop.permute.xlu0 %126  ;;  %v1025_v11 = vpop.permute.xlu1 %332 }
 0x12e   :  { %v340_v55 = vsel %vm336_vm1, %v1025_v11, %v977_v33  ;;  %v231_v33 = vmul.f32 %v959_v20, %v221_v62 }
 0x131   :  { %v1027_v13 = vpop.permute.xlu0 %266  ;;  %v1029_v14 = vpop.permute.xlu1 %411 }
 0x132   :  { %v423_v15 = vsel %vm421_vm12, %v1029_v14, %v414_v10  ;;  %v216_v10 = vsel %vm212_vm14, %v209_v52, %v211_v2  ;;  %v175_v52 = vsel %vm173_vm13, %v164_v60, %v969_v12  ;;  %v345_v12 = vsel %vm854_vm7, %v337_v44, 0.0 }
 0x133   :  { %v431_v16 = vsel %vm996_vm11, %v423_v15, 0.0  ;;  %v224_v6 = vsel %vm858_vm8, %v216_v10, 0.0  ;;  %v195_v15 = vmul.f32 %v956_v19, %v185_v63  ;;  %v223_v63 = vsel %vm854_vm7, %v215_v35, 0.0 }
 0x134   :  { %v1036_v17 = vmul.f32 %v966_v23, %v431_v16  ;;  %v234_v29 = vmul.f32 %v959_v20, %v224_v6  ;;  %v233_v38 = vmul.f32 %v959_v20, %v223_v63  ;;  %v183_v36 = vsel %vm996_vm11, %v175_v52, 0.0 }
 0x135   :  { %v1038_v18 = vpop.permute.xlu0 %270  ;;  %v129_v26 = vpop.permute.xlu1 %128  ;;  %v300_v60 = vsel %vm297_vm10, %v983_v37, %v294_v4  ;;  %v339_v6 = vsel %vm336_vm1, %v987_v39, %v1025_v11  ;;  %v193_v4 = vmul.f32 %v956_v19, %v183_v36  ;;  %v355_v28 = vmul.f32 %v961_v21, %v345_v12 }
 0x136   :  { %v308_v39 = vsel %vm1058_vm0, %v300_v60, 0.0 }
 0x139   :  { %v1040_v31 = vpop.permute.xlu0 %384  ;;  %v133_v32 = vpop.permute.xlu1 %132 }
 0x13d   :  { %v1043_v54 = vpop.permute.xlu0 %388  ;;  %v1045_v58 = vpop.permute.xlu1 %260 }
 0x141   :  { %v131_v0 = vpop.permute.xlu0 %130  ;;  %v1051_v5 = vpop.permute.xlu1 %264 }
 0x142   :  { %v138_v27 = vsel %vm134_vm15, %v131_v0, %v133_v32  ;;  %v137_v32 = vsel %vm134_vm15, %v129_v26, %v131_v0  ;;  %v222_v0 = vsel %vm858_vm8, %v214_v53, 0.0 }
 0x143   :  { %v146_v16 = vadd.f32 %v138_v27, %v873_v46  ;;  %v184_v46 = vsel %vm1058_vm0, %v176_v51, 0.0  ;;  %v145_v56 = vadd.f32 %v137_v32, %v871_v45  ;;  %v182_v45 = vsel %vm1058_vm0, %v174_v47, 0.0 }
 0x144   :  { %v194_v26 = vmul.f32 %v956_v19, %v184_v46 }
 0x145   :  { %v199_v10 = vadd.f32 %v195_v15, %v146_v16  ;;  %v1066_v25 = vpop.permute.xlu1 %390  ;;  %v192_v15 = vmul.f32 %v956_v19, %v182_v45  ;;  %v263_v16 = vpop.permute.xlu0 %262  ;;  %v348_v19 = vsel %vm858_vm8, %v340_v55, 0.0 }
 0x146   :  { %v198_v27 = vadd.f32 %v194_v26, %v145_v56  ;;  %v358_v52 = vmul.f32 %v961_v21, %v348_v19 }
 0x147   :  { %v238_v24 = vadd.f32 %v234_v29, %v199_v10  ;;  %v432_v10 = vsel %vm1058_vm0, %v424_v30, 0.0 }
 0x148   :  { %v237_v46 = vadd.f32 %v233_v38, %v198_v27 }
 0x149   :  { %v1083_v29 = vpop.permute.xlu1 %394 }
 0x14d   :  { %v125_v57 = vpop.permute.xlu1 %124 }
 0x14e   :  { %v135_v37 = vsel %vm134_vm15, %v1015_v3, %v125_v57  ;;  %v136_v61 = vsel %vm134_vm15, %v125_v57, %v1023_v8  ;;  %v232_v3 = vmul.f32 %v959_v20, %v222_v0  ;;  %v347_v8 = vsel %vm854_vm7, %v339_v6, 0.0 }
 0x14f   :  { %v143_v51 = vadd.f32 %v135_v37, %v880_v49  ;;  %v144_v35 = vadd.f32 %v136_v61, %v882_v50  ;;  %v318_v49 = vmul.f32 %v964_v22, %v308_v39  ;;  %v422_v50 = vsel %vm421_vm12, %v989_v43, %v1029_v14  ;;  %v393_v14 = vpop.permute.xlu0 %392 }
 0x150   :  { %v357_v48 = vmul.f32 %v961_v21, %v347_v8  ;;  %v273_v22 = vsel %vm272_vm2, %v1045_v58, %v263_v16  ;;  %v274_v43 = vsel %vm272_vm2, %v263_v16, %v1051_v5  ;;  %v430_v53 = vsel %vm1058_vm0, %v422_v50, 0.0 }
 0x151   :  { %v196_v11 = vadd.f32 %v192_v15, %v143_v51  ;;  %v197_v32 = vadd.f32 %v193_v4, %v144_v35  ;;  %v269_v63 = vpop.permute.xlu1 %268  ;;  %v442_v5 = vmul.f32 %v966_v23, %v432_v10  ;;  %v400_v60 = vsel %vm396_vm3, %v393_v14, %v1083_v29 }
 0x152   :  { %v275_v42 = vsel %vm272_vm2, %v1027_v13, %v269_v63  ;;  %v276_v40 = vsel %vm272_vm2, %v269_v63, %v1038_v18  ;;  %v440_v2 = vmul.f32 %v966_v23, %v430_v53  ;;  %v1210_v23 = vld [vmem:[#allocation6_spill] sm:$0xff] }
 0x153   :  { %v235_v20 = vadd.f32 %v231_v33, %v196_v11  ;;  %v236_v44 = vadd.f32 %v232_v3, %v197_v32  ;;  %v283_v41 = vadd.f32 %v275_v42, %v237_v46  ;;  %v284_v47 = vadd.f32 %v276_v40, %v238_v24  ;;  %v1212_v11 = vld [vmem:[#allocation8_spill] sm:$0xff] }
 0x154   :  { %v356_v24 = vmul.f32 %v961_v21, %v346_v9  ;;  %v522_v39 = vsub.s32 2, %v1210_v23  ;;  %v550_v33 = vsub.s32 3, %v1210_v23  ;;  %v616_v23 = vld [vmem:[%s1190_s6] sm:$0xff]  ;;  %s741_s6 = smov [#allocation3]  }
 0x155   :  { %v322_v56 = vadd.f32 %v318_v49, %v283_v41  ;;  %v323_v13 = vadd.f32 %v1021_v7, %v284_v47  ;;  %v281_v26 = vadd.f32 %v273_v22, %v235_v20  ;;  %v282_v18 = vadd.f32 %v274_v43, %v236_v44  ;;  %v387_v58 = vpop.permute.xlu1 %386  ;;  %s645_s14 = sshll.u32 %s741_s6, 4  ;;  %s646_s14 = int_to_ptr.vmem [resolvable:$true] %s645_s14 }
 0x156   :  { %v399_v7 = vsel %vm396_vm3, %v1066_v25, %v393_v14  ;;  %v452_v15 = vpop.permute.xlu0 %451  ;;  %p704_p1 = scmp.lt.s32.totalorder %s646_s14, %s646_s14 }
 0x157   :  { %v361_v38 = vadd.f32 %v357_v48, %v322_v56  ;;  %v362_v45 = vadd.f32 %v358_v52, %v323_v13  ;;  %v320_v36 = vadd.f32 %v316_v34, %v281_v26  ;;  %v321_v30 = vadd.f32 %v1004_v59, %v282_v18 }
 0x158   :  { %v397_v34 = vsel %vm396_vm3, %v1040_v31, %v387_v58  ;;  %v398_v59 = vsel %vm396_vm3, %v387_v58, %v1043_v54  ;;  %v1211_v31 = vld [vmem:[#allocation7_spill] sm:$0xff] }
 0x159   :  { %v407_v12 = vadd.f32 %v399_v7, %v361_v38  ;;  %v408_v62 = vadd.f32 %v400_v60, %v362_v45  ;;  %v359_v21 = vadd.f32 %v355_v28, %v320_v36  ;;  %v360_v9 = vadd.f32 %v356_v24, %v321_v30 }
 0x15b   :  { %v405_v0 = vadd.f32 %v397_v34, %v359_v21  ;;  %v406_v6 = vadd.f32 %v398_v59, %v360_v9  ;;  %v446_v27 = vadd.f32 %v442_v5, %v407_v12  ;;  %v447_v25 = vadd.f32 %v1013_v1, %v408_v62  ;;  %v518_v19 = vpop.permute.xlu0 %517 }
 0x15d   :  { %v444_v57 = vadd.f32 %v440_v2, %v405_v0  ;;  %v445_v29 = vadd.f32 %v1036_v17, %v406_v6  ;;  %v456_v61 = vadd.f32 %v452_v15, %v446_v27  ;;  %v457_v4 = vadd.f32 %v452_v15, %v447_v25 }
 0x15f   :  { %v454_v55 = vadd.f32 %v452_v15, %v444_v57  ;;  %v455_v37 = vadd.f32 %v452_v15, %v445_v29  ;;  %v531_v35 = vrot.slane %v456_v61, %v522_v39  ;;  %v535_v10 = vrot.slane %v457_v4, %v522_v39 }
 0x160   :  { %v475_v17 = vrot.slane %v456_v61, %v1211_v31  ;;  %v479_v8 = vrot.slane %v457_v4, %v1211_v31  ;;  %v503_v46 = vrot.slane %v456_v61, %v1212_v11  ;;  %v507_v63 = vrot.slane %v457_v4, %v1212_v11 }
 0x161   :  { %v467_v51 = vrot.slane %v454_v55, %v1211_v31  ;;  %v471_v54 = vrot.slane %v455_v37, %v1211_v31  ;;  %v523_v1 = vrot.slane %v454_v55, %v522_v39  ;;  %v527_v3 = vrot.slane %v455_v37, %v522_v39 }
 0x162   :  { %v462_v16 = vpop.permute.xlu1 %461  ;;  %v495_v32 = vrot.slane %v454_v55, %v1212_v11  ;;  %v499_v49 = vrot.slane %v455_v37, %v1212_v11  ;;  %v538_v14 = vmul.f32 %v531_v35, %v518_v19  ;;  %v539_v56 = vmul.f32 %v535_v10, %v518_v19 }
 0x163   :  { %v480_v50 = vmul.f32 %v467_v51, %v462_v16  ;;  %v481_v42 = vmul.f32 %v471_v54, %v462_v16  ;;  %v482_v40 = vmul.f32 %v475_v17, %v462_v16  ;;  %v483_v20 = vmul.f32 %v479_v8, %v462_v16 }
 0x164   :  { %v536_v22 = vmul.f32 %v523_v1, %v518_v19  ;;  %v537_v43 = vmul.f32 %v527_v3, %v518_v19  ;;  %v551_v24 = vrot.slane %v454_v55, %v550_v33  ;;  %v559_v53 = vrot.slane %v456_v61, %v550_v33 }
 0x165   :  { %v563_v38 = vrot.slane %v457_v4, %v550_v33  ;;  %v555_v45 = vrot.slane %v455_v37, %v550_v33 }
 0x167   :  { %v490_v44 = vpop.permute.xlu1 %489 }
 0x168   :  { %v508_v41 = vmul.f32 %v495_v32, %v490_v44  ;;  %v509_v47 = vmul.f32 %v499_v49, %v490_v44  ;;  %v510_v48 = vmul.f32 %v503_v46, %v490_v44  ;;  %v511_v52 = vmul.f32 %v507_v63, %v490_v44  ;;  %v626_v32 = vld [vmem:[%s1191_s7] sm:$0xff]  ;;  %s699_s7 = scalar_lea.vmem %s646_s14, 512 }
 0x169   :  { %p700_p0 = scmp.ne.s32.totalorder %s646_s14, %s699_s7  ;;  %p705_p2 = scmp.lt.s32.totalorder %s699_s7, %s699_s7 }
 0x16a   :  { %v512_v13 = vadd.f32 %v508_v41, %v480_v50  ;;  %v513_v26 = vadd.f32 %v509_v47, %v481_v42  ;;  %v514_v18 = vadd.f32 %v510_v48, %v482_v40  ;;  %v515_v28 = vadd.f32 %v511_v52, %v483_v20 }
 0x16b   :  { %p706_p3 = por %p705_p2, %p704_p1 }
 0x16c   :  { %v546_v36 = vpop.permute.xlu1 %545  ;;  %v542_v58 = vadd.f32 %v538_v14, %v514_v18  ;;  %v543_v30 = vadd.f32 %v539_v56, %v515_v28  ;;  %v540_v5 = vadd.f32 %v536_v22, %v512_v13  ;;  %v541_v7 = vadd.f32 %v537_v43, %v513_v26 }
 0x16d   :  { %v564_v60 = vmul.f32 %v551_v24, %v546_v36  ;;  %v565_v12 = vmul.f32 %v555_v45, %v546_v36  ;;  %v566_v62 = vmul.f32 %v559_v53, %v546_v36  ;;  %v567_v21 = vmul.f32 %v563_v38, %v546_v36  ;;  %p707_p4 = pnand %p706_p3, %p700_p0 }
 0x16f   :  { %v570_v9 = vadd.f32 %v566_v62, %v542_v58  ;;  %v571_v2 = vadd.f32 %v567_v21, %v543_v30  ;;  %v568_v34 = vadd.f32 %v564_v60, %v540_v5  ;;  %v569_v59 = vadd.f32 %v565_v12, %v541_v7 }
 0x171   :  { %v576_v0 = vpop.permute.xlu1 %575 }
 0x172   :  { %v580_v6 = vadd.f32 %v576_v0, %v570_v9  ;;  %v581_v27 = vadd.f32 %v576_v0, %v571_v2  ;;  %v578_v25 = vadd.f32 %v576_v0, %v568_v34  ;;  %v579_v57 = vadd.f32 %v576_v0, %v569_v59 }
 0x174   :  { %v584_v29 = vmax.f32 %v580_v6, 0.0  ;;  %v585_v15 = vmax.f32 %v581_v27, 0.0  ;;  %v582_v55 = vmax.f32 %v578_v25, 0.0  ;;  %v583_v37 = vmax.f32 %v579_v57, 0.0 }
 0x176   :  { %v589_v61 = vadd.f32 %v585_v15, %v584_v29  ;;  %v586_v4 = vadd.f32 %v583_v37, %v582_v55 }
 0x178   :  { %590 = vadd.xlane.f32.xlu1 %v589_v61  ;;  %587 = vadd.xlane.f32.xlu0 %v586_v4 }
 0x189   :  { %619 = vperm.xlu1 %693, %v616_v23  }
 0x201   :  { %v591_v39 = vpop.xlane.xlu1 %590  ;;  %v588_v16 = vpop.xlane.xlu0 %587 }
 0x202   :  { %v592_v31 = vadd.f32 %v591_v39, %v588_v16 }
 0x204   :  { %v593_v51 = vmul.f32 0.001953125, %v592_v31 }
 0x205   :  { %v620_v48 = vpop.permute.xlu1 %619 }
 0x206   :  { %v594_v54 = vsub.f32 %v582_v55, %v593_v51  ;;  %v595_v35 = vsub.f32 %v583_v37, %v593_v51  ;;  %v596_v10 = vsub.f32 %v584_v29, %v593_v51  ;;  %v597_v33 = vsub.f32 %v585_v15, %v593_v51 }
 0x208   :  { %v598_v1 = vmul.f32 %v594_v54, %v594_v54  ;;  %v599_v3 = vmul.f32 %v595_v35, %v595_v35  ;;  %v600_v8 = vmul.f32 %v596_v10, %v596_v10  ;;  %v601_v19 = vmul.f32 %v597_v33, %v597_v33 }
 0x20a   :  { %v602_v17 = vadd.f32 %v599_v3, %v598_v1  ;;  %v605_v11 = vadd.f32 %v601_v19, %v600_v8 }
 0x20c   :  { %603 = vadd.xlane.f32.xlu0 %v602_v17 }
 0x210   :  { %606 = vadd.xlane.f32.xlu0 %v605_v11 }
 0x226   :  { %629 = vperm.xlu0 %694, %v626_v32  }
 0x295   :  { %v604_v46 = vpop.xlane.xlu0 %603 }
 0x299   :  { %v607_v63 = vpop.xlane.xlu0 %606 }
 0x29a   :  { %v608_v49 = vadd.f32 %v607_v63, %v604_v46 }
 0x29c   :  { %v609_v50 = vmul.f32 0.001953125, %v608_v49 }
 0x29e   :  { %v610_v42 = vadd.f32 1e-05, %v609_v50 }
 0x2a0   :  { %697 = vrsqrt.f32 %v610_v42 }
 0x2a1   :  { %v630_v52 = vpop.permute.xlu0 %629 }
 0x2ad   :  { %v698_v40 = vpop.eup %697 }
 0x2ae   :  { %v612_v20 = vmul.f32 %v698_v40, %v594_v54  ;;  %v613_v44 = vmul.f32 %v698_v40, %v595_v35  ;;  %v614_v41 = vmul.f32 %v698_v40, %v596_v10  ;;  %v615_v47 = vmul.f32 %v698_v40, %v597_v33 }
 0x2b0   :  { %v622_v22 = vmul.f32 %v620_v48, %v612_v20  ;;  %v623_v43 = vmul.f32 %v620_v48, %v613_v44  ;;  %v624_v14 = vmul.f32 %v620_v48, %v614_v41  ;;  %v625_v56 = vmul.f32 %v620_v48, %v615_v47 }
 0x2b2   :  { %v632_v13 = vadd.f32 %v630_v52, %v622_v22  ;;  %v633_v26 = vadd.f32 %v630_v52, %v623_v43  ;;  %v634_v18 = vadd.f32 %v630_v52, %v624_v14  ;;  %v635_v28 = vadd.f32 %v630_v52, %v625_v56 }
 0x2b4   :  { %636 = vst [vmem:[#allocation3] sm:$0xff] %v632_v13  ;;  %637 = vst [vmem:[#allocation3 + $0x8] sm:$0xff] %v633_v26 }
 0x2b5   :  { %638 = vst [vmem:[#allocation3 + $0x10] sm:$0xff] %v634_v18  ;;  %639 = vst [vmem:[#allocation3 + $0x18] sm:$0xff] %v635_v28 }
 0x2b6   :  { %710 = shalt.err (!%p707_p4)
}
 0x2b7   :  { %s742_s15 = smov 256   ;;  %s743_s0 = smov 16  }
 0x2b8   :  { %651 = dma.vmem_to_hbm [thread:$0]  %s646_s14, 512, %s1192_s8, [#allocation4], %s742_s15, %s742_s15, %s743_s0  }
 0x2b9   :  { %719 = dma.done.wait [#allocation4], 512  }
 0x2ba   :  { %720 = vsyncadd [#allocation4], 4294966784 }
 0x2bb   :  { %655 = vsyncpa [#allocation4], 1 }

</bundles_post_ra>
